<compile_context>
chip_gen: v5e
topology: v5e:2x2
jax: 0.10.0
libtpu: 0.0.40
codegen_flags: <defaults>
</compile_context>

<pallas_src>
import jax
import jax.numpy as jnp
import numpy as np
from jax.experimental import pallas as pl
from jax.experimental.pallas import tpu as pltpu

_EPS = 1e-5
_SLOPE = 0.1


def down_block_kernel(xp1_ref, m1_ref, g1_ref, b1_ref, m2_ref, g2_ref, b2_ref,
                      s_ref, st_ref, o_ref, xp2_ref):
    """Fused DownBlock forward in merged-lane (row, W*C) layout.

    xp1_ref: (N, H+2, W*Cin)  f32  conv1 input, H pre-padded with zero halo rows
    m1_ref : (3, W*Cin, W*C1) bf16 conv1 banded weights, one (K, Q) matrix per kh
    g1_ref : (1, 1, W*C1)     f32  BN1 gamma tiled to lanes
    b1_ref : (1, 1, W*C1)     f32  BN1 beta  tiled to lanes
    m2_ref : (3, W*C1, W*C1)  bf16 conv2 banded weights
    g2_ref : (1, 1, W*C1)     f32  BN2 gamma tiled to lanes
    b2_ref : (1, 1, W*C1)     f32  BN2 beta  tiled to lanes
    s_ref  : (W*C1, C1)       f32  lane -> channel selection (q % C1 == c)
    st_ref : (C1, W*C1)       f32  channel -> lane broadcast (transpose of s)
    o_ref  : (N, H, W*C1)     f32  output (lane-dense, full 128-lane stores)
    xp2_ref: (N, H+2, W*C1)   f32  VMEM scratch: H-padded conv2 input
    """
    N, h_pad, _ = xp1_ref.shape
    H = h_pad - 2
    Q = o_ref.shape[-1]                      # W * C1 (lane-dense width)
    C1 = s_ref.shape[-1]
    inv_cnt = 1.0 / (N * H * (Q // C1))      # 1 / (N*H*W)

    def conv3x3(xp_ref, m_ref):
        # One banded MXU matmul per kh row tap; kw taps and the w-direction zero
        # padding are folded into the band structure of m_ref[kh]. f32 accumulate.
        acc = jnp.zeros((N, H, Q), jnp.float32)
        for kh in range(3):
            slab = xp_ref[:, kh:kh + H, :].astype(jnp.bfloat16)      # (N, H, K)
            acc = acc + jnp.einsum("nhk,kq->nhq", slab, m_ref[kh],
                                   preferred_element_type=jnp.float32)
        return acc                                                   # (N, H, Q)

    def bn_lrelu(y, g_l, b_l):
        # Training-mode BatchNorm2d (biased variance) + LeakyReLU(0.1), with
        # channels interleaved on the lane axis (lane q -> channel q % C1).
        lane_sum = jnp.sum(y, axis=(0, 1), keepdims=True)            # (1,1,Q)
        mean_c = jnp.einsum("abq,qc->abc", lane_sum, s_ref[...]) * inv_cnt
        mean_l = jnp.einsum("abc,cq->abq", mean_c, st_ref[...])      # (1,1,Q)
        cen = y - mean_l
        sq_sum = jnp.sum(cen * cen, axis=(0, 1), keepdims=True)      # (1,1,Q)
        var_c = jnp.einsum("abq,qc->abc", sq_sum, s_ref[...]) * inv_cnt
        inv_l = jnp.einsum("abc,cq->abq", jax.lax.rsqrt(var_c + _EPS), st_ref[...])
        z = cen * (inv_l * g_l) + b_l
        return jnp.where(z > 0, z, _SLOPE * z)

    # ---- ConvBlock 1 (input already halo-padded by the wrapper) --------------
    y1 = bn_lrelu(conv3x3(xp1_ref, m1_ref), g1_ref[...], b1_ref[...])  # (N,H,Q)

    # ---- ConvBlock 2: pad the VMEM-resident intermediate, halo rows only -----
    zero_row = jnp.zeros((N, 1, Q), jnp.float32)
    xp2_ref[:, 0:1, :] = zero_row
    xp2_ref[:, H + 1:H + 2, :] = zero_row
    xp2_ref[:, 1:H + 1, :] = y1
    y2 = bn_lrelu(conv3x3(xp2_ref, m2_ref), g2_ref[...], b2_ref[...])

    o_ref[...] = y2


def _banded_conv_weights(w_oihw, width):
    """PyTorch (Cout, Cin, 3, 3) -> 3 banded matrices M[kh] : (W*Cin, W*Cout), bf16.

    M[kh][w_in*Cin + ci, w_out*Cout + co] = w[co, ci, kh, kw] with kw = w_in - w_out + 1,
    zero outside 0 <= kw <= 2 (this also folds the w-direction zero padding in).
    """
    cout, cin = w_oihw.shape[0], w_oihw.shape[1]
    w = jnp.transpose(w_oihw, (2, 3, 1, 0))                 # (kh, kw, Cin, Cout)
    p, q = width * cin, width * cout
    w_in = np.arange(p) // cin
    c_in = np.arange(p) % cin
    w_out = np.arange(q) // cout
    c_out = np.arange(q) % cout
    kw = w_in[:, None] - w_out[None, :] + 1                 # (P, Q)
    valid = jnp.asarray((kw >= 0) & (kw <= 2))
    kw_c = np.clip(kw, 0, 2)
    gathered = w[:, kw_c, c_in[:, None], c_out[None, :]]    # (3, P, Q)
    return jnp.where(valid, gathered, 0.0).astype(jnp.bfloat16)


def _tile_to_lanes(v, width):
    """Per-channel vector (C,) -> (1, 1, W*C) tiled so lane q holds v[q % C]."""
    c = v.shape[0]
    return jnp.tile(v.astype(jnp.float32), width).reshape(1, 1, width * c)


def down_block(x_nchw, params):
    """DownBlock.forward (PyTorch NCHW in/out), training-mode batch-norm stats."""
    n, cin, h, w = x_nchw.shape
    c1 = params["w1"].shape[0]
    q = w * c1

    # NCHW -> NHWC, zero halo rows in H (conv pad), merge (W, C) onto lanes.
    x = jnp.transpose(x_nchw, (0, 2, 3, 1)).astype(jnp.float32)
    xp1 = jnp.pad(x, ((0, 0), (1, 1), (0, 0), (0, 0))).reshape(n, h + 2, w * cin)

    m1 = _banded_conv_weights(params["w1"], w)              # (3, W*Cin, W*C1) bf16
    m2 = _banded_conv_weights(params["w2"], w)              # (3, W*C1,  W*C1) bf16
    g1 = _tile_to_lanes(params["g1"], w)
    b1 = _tile_to_lanes(params["b1"], w)
    g2 = _tile_to_lanes(params["g2"], w)
    b2 = _tile_to_lanes(params["b2"], w)

    sel = (np.arange(q)[:, None] % c1) == np.arange(c1)[None, :]
    s = jnp.asarray(sel, jnp.float32)                       # (W*C1, C1)
    st = jnp.asarray(sel.T, jnp.float32)                    # (C1, W*C1)

    operands = (xp1, m1, g1, b1, m2, g2, b2, s, st)
    op_bytes = sum(int(o.size) * jnp.dtype(o.dtype).itemsize for o in operands)
    out_bytes = n * h * q * 4
    scratch_bytes = n * (h + 2) * q * 4
    vmem_limit = int(max(8 * 1024 * 1024, 4 * (op_bytes + out_bytes + scratch_bytes)))

    out_merged = pl.pallas_call(
        down_block_kernel,
        out_shape=jax.ShapeDtypeStruct((n, h, q), jnp.float32),
        in_specs=[pl.BlockSpec(memory_space=pltpu.MemorySpace.VMEM)] * len(operands),
        out_specs=pl.BlockSpec(memory_space=pltpu.MemorySpace.VMEM),
        scratch_shapes=[pltpu.VMEM((n, h + 2, q), jnp.float32)],
        compiler_params=pltpu.CompilerParams(vmem_limit_bytes=vmem_limit),
    )(*operands)

    # (N, H, W*C1) -> (N, H, W, C1) -> NCHW
    return jnp.transpose(out_merged.reshape(n, h, w, c1), (0, 3, 1, 2))


def init_down_block_params(key, in_channels, out_channels):
    """Deterministic synthetic init matching the PyTorch module's shapes."""
    k1, k2 = jax.random.split(key)
    return {
        # ConvBlock 1: Conv2d(in, out, 3, bias=False), BN(out)
        "w1": 0.1 * jax.random.normal(k1, (out_channels, in_channels, 3, 3), jnp.float32),
        "g1": jnp.ones((out_channels,), jnp.float32),
        "b1": jnp.zeros((out_channels,), jnp.float32),
        # ConvBlock 2: Conv2d(out, out, 3, bias=False), BN(out)
        "w2": 0.1 * jax.random.normal(k2, (out_channels, out_channels, 3, 3), jnp.float32),
        "g2": jnp.ones((out_channels,), jnp.float32),
        "b2": jnp.zeros((out_channels,), jnp.float32),
    }


# ----------------------------- pure-JAX reference -----------------------------
def _ref_conv_block(x_nhwc, w_oihw, gamma, beta):
    w = jnp.transpose(w_oihw, (2, 3, 1, 0))                 # HWIO
    y = jax.lax.conv_general_dilated(
        x_nhwc, w, window_strides=(1, 1), padding=((1, 1), (1, 1)),
        dimension_numbers=("NHWC", "HWIO", "NHWC"))
    mean = jnp.mean(y, axis=(0, 1, 2), keepdims=True)
    var = jnp.mean((y - mean) ** 2, axis=(0, 1, 2), keepdims=True)
    z = (y - mean) * jax.lax.rsqrt(var + _EPS) * gamma + beta
    return jnp.where(z > 0, z, _SLOPE * z)


def _ref_down_block(x_nchw, p):
    x = jnp.transpose(x_nchw, (0, 2, 3, 1))
    y = _ref_conv_block(x, p["w1"], p["g1"], p["b1"])
    y = _ref_conv_block(y, p["w2"], p["g2"], p["b2"])
    return jnp.transpose(y, (0, 3, 1, 2))


if __name__ == "__main__":
    key = jax.random.PRNGKey(0)
    k_x, k_p = jax.random.split(key)

    N, C_IN, C_OUT, H, W = 2, 4, 8, 16, 16
    x = jax.random.normal(k_x, (N, C_IN, H, W), jnp.float32)           # NCHW
    params = init_down_block_params(k_p, C_IN, C_OUT)

    out = jax.block_until_ready(jax.jit(down_block)(x, params))

    assert out.shape == (N, C_OUT, H, W), out.shape
    assert bool(jnp.all(jnp.isfinite(out)))

    # Loose tolerance: kernel uses bf16 MXU operands with f32 accumulation.
    ref = jax.block_until_ready(_ref_down_block(x, params))
    max_err = float(jnp.max(jnp.abs(out - ref)))
    assert max_err < 1e-1, f"max abs err vs reference: {max_err}"

    print("KERNEL_OK")
</pallas_src>

<mosaic_0001>
module attributes {stable_mosaic.version = 11 : i64} {
  func.func @down_block_kernel(%arg0: memref<2x18x64xf32, #tpu.memory_space<vmem>>, %arg1: memref<3x64x128xbf16, #tpu.memory_space<vmem>>, %arg2: memref<1x1x128xf32, #tpu.memory_space<vmem>>, %arg3: memref<1x1x128xf32, #tpu.memory_space<vmem>>, %arg4: memref<3x128x128xbf16, #tpu.memory_space<vmem>>, %arg5: memref<1x1x128xf32, #tpu.memory_space<vmem>>, %arg6: memref<1x1x128xf32, #tpu.memory_space<vmem>>, %arg7: memref<128x8xf32, #tpu.memory_space<vmem>>, %arg8: memref<8x128xf32, #tpu.memory_space<vmem>>, %arg9: memref<2x16x128xf32, #tpu.memory_space<vmem>>, %arg10: memref<2x18x128xf32, #tpu.memory_space<vmem>>) attributes {dimension_semantics = [], scalar_prefetch = 0 : i64, scratch_operands = 1 : i64, tpu.core_type = #tpu.core_type<tc>} {
    %cst = arith.constant 0.000000e+00 : f32
    %0 = vector.broadcast %cst : f32 to vector<2x16x128xf32>
    %c0 = arith.constant 0 : index
    %c0_0 = arith.constant 0 : index
    %c0_1 = arith.constant 0 : index
    %1 = vector.load %arg0[%c0, %c0_0, %c0_1] : memref<2x18x64xf32, #tpu.memory_space<vmem>>, vector<2x16x64xf32>
    %2 = arith.truncf %1 : vector<2x16x64xf32> to vector<2x16x64xbf16>
    %c0_2 = arith.constant 0 : index
    %c0_3 = arith.constant 0 : index
    %c0_4 = arith.constant 0 : index
    %3 = vector.load %arg1[%c0_2, %c0_3, %c0_4] : memref<3x64x128xbf16, #tpu.memory_space<vmem>>, vector<1x64x128xbf16>
    %4 = vector.shape_cast %3 : vector<1x64x128xbf16> to vector<64x128xbf16>
    "tpu.trace_start"() <{level = 10 : i32, message = "nhk,kq->nhq"}> : () -> ()
    %cst_5 = arith.constant dense<0.000000e+00> : vector<2x16x128xf32>
    %5 = tpu.matmul %2, %4, %cst_5 {dimension_numbers = #tpu.dot_dimension_numbers<[2], [0], [0, 1], [1], [0, 0, 0, 1, 1, 1], [], []>} : vector<2x16x64xbf16>, vector<64x128xbf16>, vector<2x16x128xf32> -> vector<2x16x128xf32>
    "tpu.trace_stop"() : () -> ()
    %6 = arith.addf %0, %5 : vector<2x16x128xf32>
    %c0_6 = arith.constant 0 : index
    %c1 = arith.constant 1 : index
    %c0_7 = arith.constant 0 : index
    %7 = vector.load %arg0[%c0_6, %c1, %c0_7] : memref<2x18x64xf32, #tpu.memory_space<vmem>>, vector<2x16x64xf32>
    %8 = arith.truncf %7 : vector<2x16x64xf32> to vector<2x16x64xbf16>
    %c1_8 = arith.constant 1 : index
    %c0_9 = arith.constant 0 : index
    %c0_10 = arith.constant 0 : index
    %9 = vector.load %arg1[%c1_8, %c0_9, %c0_10] : memref<3x64x128xbf16, #tpu.memory_space<vmem>>, vector<1x64x128xbf16>
    %10 = vector.shape_cast %9 : vector<1x64x128xbf16> to vector<64x128xbf16>
    "tpu.trace_start"() <{level = 10 : i32, message = "nhk,kq->nhq"}> : () -> ()
    %cst_11 = arith.constant dense<0.000000e+00> : vector<2x16x128xf32>
    %11 = tpu.matmul %8, %10, %cst_11 {dimension_numbers = #tpu.dot_dimension_numbers<[2], [0], [0, 1], [1], [0, 0, 0, 1, 1, 1], [], []>} : vector<2x16x64xbf16>, vector<64x128xbf16>, vector<2x16x128xf32> -> vector<2x16x128xf32>
    "tpu.trace_stop"() : () -> ()
    %12 = arith.addf %6, %11 : vector<2x16x128xf32>
    %c0_12 = arith.constant 0 : index
    %c2 = arith.constant 2 : index
    %c0_13 = arith.constant 0 : index
    %13 = vector.load %arg0[%c0_12, %c2, %c0_13] : memref<2x18x64xf32, #tpu.memory_space<vmem>>, vector<2x16x64xf32>
    %14 = arith.truncf %13 : vector<2x16x64xf32> to vector<2x16x64xbf16>
    %c2_14 = arith.constant 2 : index
    %c0_15 = arith.constant 0 : index
    %c0_16 = arith.constant 0 : index
    %15 = vector.load %arg1[%c2_14, %c0_15, %c0_16] : memref<3x64x128xbf16, #tpu.memory_space<vmem>>, vector<1x64x128xbf16>
    %16 = vector.shape_cast %15 : vector<1x64x128xbf16> to vector<64x128xbf16>
    "tpu.trace_start"() <{level = 10 : i32, message = "nhk,kq->nhq"}> : () -> ()
    %cst_17 = arith.constant dense<0.000000e+00> : vector<2x16x128xf32>
    %17 = tpu.matmul %14, %16, %cst_17 {dimension_numbers = #tpu.dot_dimension_numbers<[2], [0], [0, 1], [1], [0, 0, 0, 1, 1, 1], [], []>} : vector<2x16x64xbf16>, vector<64x128xbf16>, vector<2x16x128xf32> -> vector<2x16x128xf32>
    "tpu.trace_stop"() : () -> ()
    %18 = arith.addf %12, %17 : vector<2x16x128xf32>
    %c0_18 = arith.constant 0 : index
    %c0_19 = arith.constant 0 : index
    %c0_20 = arith.constant 0 : index
    %19 = vector.load %arg2[%c0_18, %c0_19, %c0_20] : memref<1x1x128xf32, #tpu.memory_space<vmem>>, vector<1x1x128xf32>
    %c0_21 = arith.constant 0 : index
    %c0_22 = arith.constant 0 : index
    %c0_23 = arith.constant 0 : index
    %20 = vector.load %arg3[%c0_21, %c0_22, %c0_23] : memref<1x1x128xf32, #tpu.memory_space<vmem>>, vector<1x1x128xf32>
    %cst_24 = arith.constant dense<0.000000e+00> : vector<128xf32>
    %21 = vector.multi_reduction <add>, %18, %cst_24 [0, 1] : vector<2x16x128xf32> to vector<128xf32>
    %22 = vector.shape_cast %21 : vector<128xf32> to vector<1x1x128xf32>
    %c0_25 = arith.constant 0 : index
    %c0_26 = arith.constant 0 : index
    %23 = vector.load %arg7[%c0_25, %c0_26] : memref<128x8xf32, #tpu.memory_space<vmem>>, vector<128x8xf32>
    "tpu.trace_start"() <{level = 10 : i32, message = "abq,qc->abc"}> : () -> ()
    %cst_27 = arith.constant dense<0.000000e+00> : vector<1x1x8xf32>
    %24 = tpu.matmul %22, %23, %cst_27 {dimension_numbers = #tpu.dot_dimension_numbers<[2], [0], [0, 1], [1], [0, 0, 0, 1, 1, 1], [], []>} : vector<1x1x128xf32>, vector<128x8xf32>, vector<1x1x8xf32> -> vector<1x1x8xf32>
    "tpu.trace_stop"() : () -> ()
    %cst_28 = arith.constant 0.001953125 : f32
    %25 = vector.broadcast %cst_28 : f32 to vector<1x1x8xf32>
    %26 = arith.mulf %24, %25 : vector<1x1x8xf32>
    %c0_29 = arith.constant 0 : index
    %c0_30 = arith.constant 0 : index
    %27 = vector.load %arg8[%c0_29, %c0_30] : memref<8x128xf32, #tpu.memory_space<vmem>>, vector<8x128xf32>
    "tpu.trace_start"() <{level = 10 : i32, message = "abc,cq->abq"}> : () -> ()
    %cst_31 = arith.constant dense<0.000000e+00> : vector<1x1x128xf32>
    %28 = tpu.matmul %26, %27, %cst_31 {dimension_numbers = #tpu.dot_dimension_numbers<[2], [0], [0, 1], [1], [0, 0, 0, 1, 1, 1], [], []>} : vector<1x1x8xf32>, vector<8x128xf32>, vector<1x1x128xf32> -> vector<1x1x128xf32>
    "tpu.trace_stop"() : () -> ()
    %29 = vector.broadcast %28 : vector<1x1x128xf32> to vector<2x16x128xf32>
    %30 = arith.subf %18, %29 : vector<2x16x128xf32>
    %31 = arith.mulf %30, %30 : vector<2x16x128xf32>
    %cst_32 = arith.constant dense<0.000000e+00> : vector<128xf32>
    %32 = vector.multi_reduction <add>, %31, %cst_32 [0, 1] : vector<2x16x128xf32> to vector<128xf32>
    %33 = vector.shape_cast %32 : vector<128xf32> to vector<1x1x128xf32>
    %c0_33 = arith.constant 0 : index
    %c0_34 = arith.constant 0 : index
    %34 = vector.load %arg7[%c0_33, %c0_34] : memref<128x8xf32, #tpu.memory_space<vmem>>, vector<128x8xf32>
    "tpu.trace_start"() <{level = 10 : i32, message = "abq,qc->abc"}> : () -> ()
    %cst_35 = arith.constant dense<0.000000e+00> : vector<1x1x8xf32>
    %35 = tpu.matmul %33, %34, %cst_35 {dimension_numbers = #tpu.dot_dimension_numbers<[2], [0], [0, 1], [1], [0, 0, 0, 1, 1, 1], [], []>} : vector<1x1x128xf32>, vector<128x8xf32>, vector<1x1x8xf32> -> vector<1x1x8xf32>
    "tpu.trace_stop"() : () -> ()
    %cst_36 = arith.constant 0.001953125 : f32
    %36 = vector.broadcast %cst_36 : f32 to vector<1x1x8xf32>
    %37 = arith.mulf %35, %36 : vector<1x1x8xf32>
    %cst_37 = arith.constant 9.99999974E-6 : f32
    %38 = vector.broadcast %cst_37 : f32 to vector<1x1x8xf32>
    %39 = arith.addf %37, %38 : vector<1x1x8xf32>
    %40 = math.rsqrt %39 : vector<1x1x8xf32>
    %c0_38 = arith.constant 0 : index
    %c0_39 = arith.constant 0 : index
    %41 = vector.load %arg8[%c0_38, %c0_39] : memref<8x128xf32, #tpu.memory_space<vmem>>, vector<8x128xf32>
    "tpu.trace_start"() <{level = 10 : i32, message = "abc,cq->abq"}> : () -> ()
    %cst_40 = arith.constant dense<0.000000e+00> : vector<1x1x128xf32>
    %42 = tpu.matmul %40, %41, %cst_40 {dimension_numbers = #tpu.dot_dimension_numbers<[2], [0], [0, 1], [1], [0, 0, 0, 1, 1, 1], [], []>} : vector<1x1x8xf32>, vector<8x128xf32>, vector<1x1x128xf32> -> vector<1x1x128xf32>
    "tpu.trace_stop"() : () -> ()
    %43 = arith.mulf %42, %19 : vector<1x1x128xf32>
    %44 = vector.broadcast %43 : vector<1x1x128xf32> to vector<2x16x128xf32>
    %45 = arith.mulf %30, %44 : vector<2x16x128xf32>
    %46 = vector.broadcast %20 : vector<1x1x128xf32> to vector<2x16x128xf32>
    %47 = arith.addf %45, %46 : vector<2x16x128xf32>
    %cst_41 = arith.constant 0.000000e+00 : f32
    %48 = vector.broadcast %cst_41 : f32 to vector<2x16x128xf32>
    %49 = arith.cmpf ogt, %47, %48 : vector<2x16x128xf32>
    %cst_42 = arith.constant 1.000000e-01 : f32
    %50 = vector.broadcast %cst_42 : f32 to vector<2x16x128xf32>
    %51 = arith.mulf %50, %47 : vector<2x16x128xf32>
    %52 = arith.select %49, %47, %51 : vector<2x16x128xi1>, vector<2x16x128xf32>
    %cst_43 = arith.constant 0.000000e+00 : f32
    %53 = vector.broadcast %cst_43 : f32 to vector<2x1x128xf32>
    %c0_44 = arith.constant 0 : index
    %c0_45 = arith.constant 0 : index
    %c0_46 = arith.constant 0 : index
    %54 = vector.load %arg10[%c0_44, %c0_45, %c0_46] : memref<2x18x128xf32, #tpu.memory_space<vmem>>, vector<2x1x128xf32>
    tpu.vector_store %arg10[%c0_44, %c0_45, %c0_46], %53 {strides = array<i32>} : memref<2x18x128xf32, #tpu.memory_space<vmem>>, vector<2x1x128xf32>,
    %c0_47 = arith.constant 0 : index
    %c17 = arith.constant 17 : index
    %c0_48 = arith.constant 0 : index
    %55 = vector.load %arg10[%c0_47, %c17, %c0_48] : memref<2x18x128xf32, #tpu.memory_space<vmem>>, vector<2x1x128xf32>
    tpu.vector_store %arg10[%c0_47, %c17, %c0_48], %53 {strides = array<i32>} : memref<2x18x128xf32, #tpu.memory_space<vmem>>, vector<2x1x128xf32>,
    %c0_49 = arith.constant 0 : index
    %c1_50 = arith.constant 1 : index
    %c0_51 = arith.constant 0 : index
    %56 = vector.load %arg10[%c0_49, %c1_50, %c0_51] : memref<2x18x128xf32, #tpu.memory_space<vmem>>, vector<2x16x128xf32>
    tpu.vector_store %arg10[%c0_49, %c1_50, %c0_51], %52 {strides = array<i32>} : memref<2x18x128xf32, #tpu.memory_space<vmem>>, vector<2x16x128xf32>,
    %cst_52 = arith.constant 0.000000e+00 : f32
    %57 = vector.broadcast %cst_52 : f32 to vector<2x16x128xf32>
    %c0_53 = arith.constant 0 : index
    %c0_54 = arith.constant 0 : index
    %c0_55 = arith.constant 0 : index
    %58 = vector.load %arg10[%c0_53, %c0_54, %c0_55] : memref<2x18x128xf32, #tpu.memory_space<vmem>>, vector<2x16x128xf32>
    %59 = arith.truncf %58 : vector<2x16x128xf32> to vector<2x16x128xbf16>
    %c0_56 = arith.constant 0 : index
    %c0_57 = arith.constant 0 : index
    %c0_58 = arith.constant 0 : index
    %60 = vector.load %arg4[%c0_56, %c0_57, %c0_58] : memref<3x128x128xbf16, #tpu.memory_space<vmem>>, vector<1x128x128xbf16>
    %61 = vector.shape_cast %60 : vector<1x128x128xbf16> to vector<128x128xbf16>
    "tpu.trace_start"() <{level = 10 : i32, message = "nhk,kq->nhq"}> : () -> ()
    %cst_59 = arith.constant dense<0.000000e+00> : vector<2x16x128xf32>
    %62 = tpu.matmul %59, %61, %cst_59 {dimension_numbers = #tpu.dot_dimension_numbers<[2], [0], [0, 1], [1], [0, 0, 0, 1, 1, 1], [], []>} : vector<2x16x128xbf16>, vector<128x128xbf16>, vector<2x16x128xf32> -> vector<2x16x128xf32>
    "tpu.trace_stop"() : () -> ()
    %63 = arith.addf %57, %62 : vector<2x16x128xf32>
    %c0_60 = arith.constant 0 : index
    %c1_61 = arith.constant 1 : index
    %c0_62 = arith.constant 0 : index
    %64 = vector.load %arg10[%c0_60, %c1_61, %c0_62] : memref<2x18x128xf32, #tpu.memory_space<vmem>>, vector<2x16x128xf32>
    %65 = arith.truncf %64 : vector<2x16x128xf32> to vector<2x16x128xbf16>
    %c1_63 = arith.constant 1 : index
    %c0_64 = arith.constant 0 : index
    %c0_65 = arith.constant 0 : index
    %66 = vector.load %arg4[%c1_63, %c0_64, %c0_65] : memref<3x128x128xbf16, #tpu.memory_space<vmem>>, vector<1x128x128xbf16>
    %67 = vector.shape_cast %66 : vector<1x128x128xbf16> to vector<128x128xbf16>
    "tpu.trace_start"() <{level = 10 : i32, message = "nhk,kq->nhq"}> : () -> ()
    %cst_66 = arith.constant dense<0.000000e+00> : vector<2x16x128xf32>
    %68 = tpu.matmul %65, %67, %cst_66 {dimension_numbers = #tpu.dot_dimension_numbers<[2], [0], [0, 1], [1], [0, 0, 0, 1, 1, 1], [], []>} : vector<2x16x128xbf16>, vector<128x128xbf16>, vector<2x16x128xf32> -> vector<2x16x128xf32>
    "tpu.trace_stop"() : () -> ()
    %69 = arith.addf %63, %68 : vector<2x16x128xf32>
    %c0_67 = arith.constant 0 : index
    %c2_68 = arith.constant 2 : index
    %c0_69 = arith.constant 0 : index
    %70 = vector.load %arg10[%c0_67, %c2_68, %c0_69] : memref<2x18x128xf32, #tpu.memory_space<vmem>>, vector<2x16x128xf32>
    %71 = arith.truncf %70 : vector<2x16x128xf32> to vector<2x16x128xbf16>
    %c2_70 = arith.constant 2 : index
    %c0_71 = arith.constant 0 : index
    %c0_72 = arith.constant 0 : index
    %72 = vector.load %arg4[%c2_70, %c0_71, %c0_72] : memref<3x128x128xbf16, #tpu.memory_space<vmem>>, vector<1x128x128xbf16>
    %73 = vector.shape_cast %72 : vector<1x128x128xbf16> to vector<128x128xbf16>
    "tpu.trace_start"() <{level = 10 : i32, message = "nhk,kq->nhq"}> : () -> ()
    %cst_73 = arith.constant dense<0.000000e+00> : vector<2x16x128xf32>
    %74 = tpu.matmul %71, %73, %cst_73 {dimension_numbers = #tpu.dot_dimension_numbers<[2], [0], [0, 1], [1], [0, 0, 0, 1, 1, 1], [], []>} : vector<2x16x128xbf16>, vector<128x128xbf16>, vector<2x16x128xf32> -> vector<2x16x128xf32>
    "tpu.trace_stop"() : () -> ()
    %75 = arith.addf %69, %74 : vector<2x16x128xf32>
    %c0_74 = arith.constant 0 : index
    %c0_75 = arith.constant 0 : index
    %c0_76 = arith.constant 0 : index
    %76 = vector.load %arg5[%c0_74, %c0_75, %c0_76] : memref<1x1x128xf32, #tpu.memory_space<vmem>>, vector<1x1x128xf32>
    %c0_77 = arith.constant 0 : index
    %c0_78 = arith.constant 0 : index
    %c0_79 = arith.constant 0 : index
    %77 = vector.load %arg6[%c0_77, %c0_78, %c0_79] : memref<1x1x128xf32, #tpu.memory_space<vmem>>, vector<1x1x128xf32>
    %cst_80 = arith.constant dense<0.000000e+00> : vector<128xf32>
    %78 = vector.multi_reduction <add>, %75, %cst_80 [0, 1] : vector<2x16x128xf32> to vector<128xf32>
    %79 = vector.shape_cast %78 : vector<128xf32> to vector<1x1x128xf32>
    %c0_81 = arith.constant 0 : index
    %c0_82 = arith.constant 0 : index
    %80 = vector.load %arg7[%c0_81, %c0_82] : memref<128x8xf32, #tpu.memory_space<vmem>>, vector<128x8xf32>
    "tpu.trace_start"() <{level = 10 : i32, message = "abq,qc->abc"}> : () -> ()
    %cst_83 = arith.constant dense<0.000000e+00> : vector<1x1x8xf32>
    %81 = tpu.matmul %79, %80, %cst_83 {dimension_numbers = #tpu.dot_dimension_numbers<[2], [0], [0, 1], [1], [0, 0, 0, 1, 1, 1], [], []>} : vector<1x1x128xf32>, vector<128x8xf32>, vector<1x1x8xf32> -> vector<1x1x8xf32>
    "tpu.trace_stop"() : () -> ()
    %cst_84 = arith.constant 0.001953125 : f32
    %82 = vector.broadcast %cst_84 : f32 to vector<1x1x8xf32>
    %83 = arith.mulf %81, %82 : vector<1x1x8xf32>
    %c0_85 = arith.constant 0 : index
    %c0_86 = arith.constant 0 : index
    %84 = vector.load %arg8[%c0_85, %c0_86] : memref<8x128xf32, #tpu.memory_space<vmem>>, vector<8x128xf32>
    "tpu.trace_start"() <{level = 10 : i32, message = "abc,cq->abq"}> : () -> ()
    %cst_87 = arith.constant dense<0.000000e+00> : vector<1x1x128xf32>
    %85 = tpu.matmul %83, %84, %cst_87 {dimension_numbers = #tpu.dot_dimension_numbers<[2], [0], [0, 1], [1], [0, 0, 0, 1, 1, 1], [], []>} : vector<1x1x8xf32>, vector<8x128xf32>, vector<1x1x128xf32> -> vector<1x1x128xf32>
    "tpu.trace_stop"() : () -> ()
    %86 = vector.broadcast %85 : vector<1x1x128xf32> to vector<2x16x128xf32>
    %87 = arith.subf %75, %86 : vector<2x16x128xf32>
    %88 = arith.mulf %87, %87 : vector<2x16x128xf32>
    %cst_88 = arith.constant dense<0.000000e+00> : vector<128xf32>
    %89 = vector.multi_reduction <add>, %88, %cst_88 [0, 1] : vector<2x16x128xf32> to vector<128xf32>
    %90 = vector.shape_cast %89 : vector<128xf32> to vector<1x1x128xf32>
    %c0_89 = arith.constant 0 : index
    %c0_90 = arith.constant 0 : index
    %91 = vector.load %arg7[%c0_89, %c0_90] : memref<128x8xf32, #tpu.memory_space<vmem>>, vector<128x8xf32>
    "tpu.trace_start"() <{level = 10 : i32, message = "abq,qc->abc"}> : () -> ()
    %cst_91 = arith.constant dense<0.000000e+00> : vector<1x1x8xf32>
    %92 = tpu.matmul %90, %91, %cst_91 {dimension_numbers = #tpu.dot_dimension_numbers<[2], [0], [0, 1], [1], [0, 0, 0, 1, 1, 1], [], []>} : vector<1x1x128xf32>, vector<128x8xf32>, vector<1x1x8xf32> -> vector<1x1x8xf32>
    "tpu.trace_stop"() : () -> ()
    %cst_92 = arith.constant 0.001953125 : f32
    %93 = vector.broadcast %cst_92 : f32 to vector<1x1x8xf32>
    %94 = arith.mulf %92, %93 : vector<1x1x8xf32>
    %cst_93 = arith.constant 9.99999974E-6 : f32
    %95 = vector.broadcast %cst_93 : f32 to vector<1x1x8xf32>
    %96 = arith.addf %94, %95 : vector<1x1x8xf32>
    %97 = math.rsqrt %96 : vector<1x1x8xf32>
    %c0_94 = arith.constant 0 : index
    %c0_95 = arith.constant 0 : index
    %98 = vector.load %arg8[%c0_94, %c0_95] : memref<8x128xf32, #tpu.memory_space<vmem>>, vector<8x128xf32>
    "tpu.trace_start"() <{level = 10 : i32, message = "abc,cq->abq"}> : () -> ()
    %cst_96 = arith.constant dense<0.000000e+00> : vector<1x1x128xf32>
    %99 = tpu.matmul %97, %98, %cst_96 {dimension_numbers = #tpu.dot_dimension_numbers<[2], [0], [0, 1], [1], [0, 0, 0, 1, 1, 1], [], []>} : vector<1x1x8xf32>, vector<8x128xf32>, vector<1x1x128xf32> -> vector<1x1x128xf32>
    "tpu.trace_stop"() : () -> ()
    %100 = arith.mulf %99, %76 : vector<1x1x128xf32>
    %101 = vector.broadcast %100 : vector<1x1x128xf32> to vector<2x16x128xf32>
    %102 = arith.mulf %87, %101 : vector<2x16x128xf32>
    %103 = vector.broadcast %77 : vector<1x1x128xf32> to vector<2x16x128xf32>
    %104 = arith.addf %102, %103 : vector<2x16x128xf32>
    %cst_97 = arith.constant 0.000000e+00 : f32
    %105 = vector.broadcast %cst_97 : f32 to vector<2x16x128xf32>
    %106 = arith.cmpf ogt, %104, %105 : vector<2x16x128xf32>
    %cst_98 = arith.constant 1.000000e-01 : f32
    %107 = vector.broadcast %cst_98 : f32 to vector<2x16x128xf32>
    %108 = arith.mulf %107, %104 : vector<2x16x128xf32>
    %109 = arith.select %106, %104, %108 : vector<2x16x128xi1>, vector<2x16x128xf32>
    %c0_99 = arith.constant 0 : index
    %c0_100 = arith.constant 0 : index
    %c0_101 = arith.constant 0 : index
    %110 = vector.load %arg9[%c0_99, %c0_100, %c0_101] : memref<2x16x128xf32, #tpu.memory_space<vmem>>, vector<2x16x128xf32>
    tpu.vector_store %arg9[%c0_99, %c0_100, %c0_101], %109 {strides = array<i32>} : memref<2x16x128xf32, #tpu.memory_space<vmem>>, vector<2x16x128xf32>,
    return
  }
}

</mosaic_0001>

<bundles_post_ra>
// kernel: tile.23
= control target key start
LH: loop header
LB: loop body
LE: loop exit
PB: predicated region body
PF: predicated region fallthrough
CT: control target
= control target key end

     0   :  { %s28_s0 = inlined_call_operand.vmem [shape: f32[8], index: 0, kind: input, shape index: {}]   ;;  %s29_s1 = inlined_call_operand.vmem [shape: f32[16,8], index: 1, kind: output, shape index: {}]  }
   0x1   :  { %v4_v0 = vld [vmem:[%s28_s0] ss:$0 sm:$0xff] }
   0x2   :  { %5 = vst [vmem:[%s29_s1] sm:$0xff] %v4_v0 }
   0x3   :  { %8 = vst [vmem:[%s29_s1 + $0x8] sm:$0xff] %v4_v0 }

// kernel: tile.24
= control target key start
LH: loop header
LB: loop body
LE: loop exit
PB: predicated region body
PF: predicated region fallthrough
CT: control target
= control target key end

     0   :  { %s131_s10 = smov 120   ;;  %s132_s11 = smov 104   ;;  %vm3_vm0 = vcmask 64512   ;;  %vm9_vm1 = vcmask 1048512   ;;  %vm15_vm2 = vcmask 982912   ;;  %vm21_vm3 = vcmask 917312   ;;  %s207_s0 = inlined_call_operand.vmem [shape: f32[16,8], index: 0, kind: input, shape index: {}]   ;;  %s208_s1 = inlined_call_operand.vmem [shape: f32[1,1,128], index: 1, kind: output, shape index: {}]  }
   0x1   :  { %v101_v0 = vld [vmem:[%s207_s0 + $0xf] sm:$0x1]   ;;  %v103_v1 = vld [vmem:[%s207_s0 + $0xd] sm:$0x1]   ;;  %v105_v2 = vld [vmem:[%s207_s0 + $0xb] sm:$0x1]  }
   0x2   :  { %7 = vrot.lane.b32.xlu0 %v101_v0, %s131_s10  ;;  %19 = vrot.lane.b32.xlu1 %v103_v1, %s132_s11  ;;  %s133_s14 = smov 88   ;;  %v102_v3 = vld [vmem:[%s207_s0 + $0xe] sm:$0x1]   ;;  %v104_v4 = vld [vmem:[%s207_s0 + $0xc] sm:$0x1]   ;;  %s134_s19 = smov 112  }
   0x3   :  { %31 = vrot.lane.b32.xlu2 %v105_v2, %s133_s14  ;;  %s135_s20 = smov 96   ;;  %v106_v5 = vld [vmem:[%s207_s0 + $0xa] sm:$0x1]   ;;  %s136_s23 = smov 80   ;;  %v107_v6 = vld [vmem:[%s207_s0 + $0x9] sm:$0x1]  }
   0x4   :  { %v108_v7 = vld [vmem:[%s207_s0 + $0x8] sm:$0x1]   ;;  %s137_s28 = smov 72   ;;  %s138_s29 = smov 64   ;;  %v109_v8 = vld [vmem:[%s207_s0 + $0x7] sm:$0x1]  }
   0x5   :  { %s139_s3 = smov 56   ;;  %v110_v9 = vld [vmem:[%s207_s0 + $0x6] sm:$0x1]   ;;  %v111_v10 = vld [vmem:[%s207_s0 + $0x5] sm:$0x1]   ;;  %s140_s8 = smov 48  }
   0x6   :  { %s141_s9 = smov 40   ;;  %v112_v11 = vld [vmem:[%s207_s0 + $0x4] sm:$0x1]   ;;  %s142_s12 = smov 32   ;;  %v113_v12 = vld [vmem:[%s207_s0 + $0x3] sm:$0x1]  }
   0x7   :  { %v114_v13 = vld [vmem:[%s207_s0 + $0x2] sm:$0x1]   ;;  %s143_s17 = smov 24   ;;  %s144_s18 = smov 16   ;;  %v115_v14 = vld [vmem:[%s207_s0 + $0x1] sm:$0x1]  }
   0x8   :  { %s145_s21 = smov 8   ;;  %v2_v15 = vld [vmem:[%s207_s0] sm:$0x1]   ;;  %vm27_vm4 = vcmask 851712   ;;  %vm33_vm5 = vcmask 786112   ;;  %vm39_vm6 = vcmask 720512  }
   0x9   :  { %4 = vst.msk [vmem:[#allocation0] sm:$0x1] %vm3_vm0, %v2_v15   ;;  %vm45_vm7 = vcmask 654912   ;;  %vm51_vm8 = vcmask 589312   ;;  %vm57_vm9 = vcmask 523712   ;;  %vm63_vm10 = vcmask 458112  }
   0xa   :  { %13 = vrot.lane.b32.xlu0 %v102_v3, %s134_s19  ;;  %25 = vrot.lane.b32.xlu1 %v104_v4, %s135_s20  ;;  %vm69_vm11 = vcmask 392512   ;;  %vm75_vm12 = vcmask 326912   ;;  %vm81_vm13 = vcmask 261312   ;;  %vm87_vm14 = vcmask 195712  }
   0xb   :  { %37 = vrot.lane.b32.xlu2 %v106_v5, %s136_s23  ;;  %vm93_vm15 = vcmask 130112  }
  0x12   :  { %43 = vrot.lane.b32.xlu0 %v107_v6, %s137_s28  ;;  %49 = vrot.lane.b32.xlu1 %v108_v7, %s138_s29 }
  0x13   :  { %55 = vrot.lane.b32.xlu2 %v109_v8, %s139_s3 }
  0x1a   :  { %61 = vrot.lane.b32.xlu0 %v110_v9, %s140_s8  ;;  %67 = vrot.lane.b32.xlu1 %v111_v10, %s141_s9 }
  0x1b   :  { %73 = vrot.lane.b32.xlu2 %v112_v11, %s142_s12 }
  0x22   :  { %79 = vrot.lane.b32.xlu0 %v113_v12, %s143_s17  ;;  %85 = vrot.lane.b32.xlu1 %v114_v13, %s144_s18 }
  0x23   :  { %91 = vrot.lane.b32.xlu2 %v115_v14, %s145_s21 }
  0x5d   :  { %v32_v16 = vpop.permute.xlu2 %31  }
  0x65   :  { %v38_v17 = vpop.permute.xlu2 %37  }
  0x6d   :  { %v56_v18 = vpop.permute.xlu2 %55  }
  0x74   :  { %v8_v19 = vpop.permute.xlu0 %7   ;;  %v20_v20 = vpop.permute.xlu1 %19  }
  0x75   :  { %10 = vst.msk [vmem:[#allocation0] sm:$0x1] %vm9_vm1, %v8_v19   ;;  %v74_v21 = vpop.permute.xlu2 %73  }
  0x7c   :  { %v14_v22 = vpop.permute.xlu0 %13   ;;  %v26_v23 = vpop.permute.xlu1 %25  }
  0x7d   :  { %16 = vst.msk [vmem:[#allocation0] sm:$0x1] %vm15_vm2, %v14_v22   ;;  %v92_v24 = vpop.permute.xlu2 %91  }
  0x7e   :  { %22 = vst.msk [vmem:[#allocation0] sm:$0x1] %vm21_vm3, %v20_v20  }
  0x7f   :  { %28 = vst.msk [vmem:[#allocation0] sm:$0x1] %vm27_vm4, %v26_v23  }
  0x80   :  { %34 = vst.msk [vmem:[#allocation0] sm:$0x1] %vm33_vm5, %v32_v16  }
  0x81   :  { %40 = vst.msk [vmem:[#allocation0] sm:$0x1] %vm39_vm6, %v38_v17  }
  0x84   :  { %v44_v25 = vpop.permute.xlu0 %43   ;;  %v50_v26 = vpop.permute.xlu1 %49  }
  0x85   :  { %46 = vst.msk [vmem:[#allocation0] sm:$0x1] %vm45_vm7, %v44_v25  }
  0x86   :  { %52 = vst.msk [vmem:[#allocation0] sm:$0x1] %vm51_vm8, %v50_v26  }
  0x87   :  { %58 = vst.msk [vmem:[#allocation0] sm:$0x1] %vm57_vm9, %v56_v18  }
  0x8c   :  { %v62_v27 = vpop.permute.xlu0 %61   ;;  %v68_v28 = vpop.permute.xlu1 %67  }
  0x8d   :  { %64 = vst.msk [vmem:[#allocation0] sm:$0x1] %vm63_vm10, %v62_v27  }
  0x8e   :  { %70 = vst.msk [vmem:[#allocation0] sm:$0x1] %vm69_vm11, %v68_v28  }
  0x8f   :  { %76 = vst.msk [vmem:[#allocation0] sm:$0x1] %vm75_vm12, %v74_v21  }
  0x94   :  { %v80_v29 = vpop.permute.xlu0 %79   ;;  %v86_v30 = vpop.permute.xlu1 %85  }
  0x95   :  { %82 = vst.msk [vmem:[#allocation0] sm:$0x1] %vm81_vm13, %v80_v29  }
  0x96   :  { %88 = vst.msk [vmem:[#allocation0] sm:$0x1] %vm87_vm14, %v86_v30  }
  0x97   :  { %94 = vst.msk [vmem:[#allocation0] sm:$0x1] %vm93_vm15, %v92_v24  }
  0x9e   :  { %v97_v31 = vld [vmem:[#allocation0] sm:$0x1] }
  0x9f   :  { %100 = vst [vmem:[%s208_s1] sm:$0x1] %v97_v31 }

// kernel: down_block.1
= control target key start
LH: loop header
LB: loop body
LE: loop exit
PB: predicated region body
PF: predicated region fallthrough
CT: control target
= control target key end

     0   :  { %vm100_vm0 = vcmask 523264   ;;  %vm314_vm1 = vcmask 64512   ;;  %s1626_s1 = inlined_call_operand.vmem [shape: bf16[3,64,128], index: 1, kind: input, shape index: {}]   ;;  %s1627_s0 = inlined_call_operand.vmem [shape: f32[2,18,64], index: 0, kind: input, shape index: {}]   ;;  %s1628_s7 = inlined_call_operand.vmem [shape: f32[128,8], index: 7, kind: input, shape index: {}]   ;;  %s1629_s8 = inlined_call_operand.vmem [shape: f32[8,128], index: 8, kind: input, shape index: {}]   ;;  %s1630_s3 = inlined_call_operand.vmem [shape: f32[1,1,128], index: 3, kind: input, shape index: {}]   ;;  %s1631_s4 = inlined_call_operand.vmem [shape: bf16[3,128,128], index: 4, kind: input, shape index: {}]   ;;  %s1632_s2 = inlined_call_operand.vmem [shape: f32[1,1,128], index: 2, kind: input, shape index: {}]   ;;  %s1633_s6 = inlined_call_operand.vmem [shape: f32[1,1,128], index: 6, kind: input, shape index: {}]   ;;  %s1634_s5 = inlined_call_operand.vmem [shape: f32[1,1,128], index: 5, kind: input, shape index: {}]   ;;  %s1635_s9 = inlined_call_operand.vmem [shape: f32[2,16,128], index: 9, kind: output, shape index: {}]  }
   0x1   :  { %v1180_v0 = vld [vmem:[%s1626_s1 + $0x38] sm:$0xff]  ;;  %v1179_v3 = vld [vmem:[%s1626_s1 + $0x30] sm:$0xff]  ;;  %v49_v6 = vld [vmem:[%s1627_s0 + $0x1] sm:$0xff] }
   0x2   :  { %v1176_v1 = vld [vmem:[%s1626_s1 + $0x18] sm:$0xff]  ;;  %111 = vmatpush.bf16.msra.mxu0 %v1180_v0  ;;  %v1175_v4 = vld [vmem:[%s1626_s1 + $0x10] sm:$0xff]  ;;  %v33_v8 = vld [vmem:[%s1627_s0] sm:$0xff]  ;;  %v53_v9 = vpack.c.bf16 %v49_v6, %v49_v6 }
   0x3   :  { %v1184_v2 = vld [vmem:[%s1626_s1 + $0x58] sm:$0xff]  ;;  %170 = vmatpush.bf16.msra.mxu1 %v1176_v1  ;;  %v1183_v5 = vld [vmem:[%s1626_s1 + $0x50] sm:$0xff]  ;;  %v34_v11 = vld [vmem:[%s1627_s0 + $0x8] sm:$0xff]  ;;  %v37_v12 = vpack.c.bf16 %v33_v8, %v33_v8 }
   0x4   :  { %246 = vmatpush.bf16.msra.mxu2 %v1184_v2  ;;  %v50_v7 = vld [vmem:[%s1627_s0 + $0x9] sm:$0xff]  ;;  %v38_v17 = vpack.c.bf16 %v34_v11, %v34_v11  ;;  %v70_v21 = vunpack.c.l.b16 %v53_v9  ;;  %v1177_v25 = vld [vmem:[%s1626_s1 + $0x20] sm:$0xff]  ;;  %v35_v35 = vld [vmem:[%s1627_s0 + $0x18] sm:$0xff] }
   0x5   :  { %v54_v10 = vpack.c.bf16 %v50_v7, %v50_v7  ;;  %v185_v13 = vld [vmem:[%s1627_s0 + $0x2] sm:$0xff]  ;;  %v186_v14 = vld [vmem:[%s1627_s0 + $0xa] sm:$0xff]  ;;  %v130_v23 = vunpack.c.l.b16 %v37_v12  ;;  %v51_v33 = vld [vmem:[%s1627_s0 + $0x19] sm:$0xff]  ;;  %v39_v41 = vpack.c.bf16 %v35_v35, %v35_v35 }
   0x6   :  { %112 = vmatpush.bf16.msra.mxu0 %v1179_v3  ;;  %v1178_v15 = vld [vmem:[%s1626_s1 + $0x28] sm:$0xff]  ;;  %v189_v18 = vpack.c.bf16 %v185_v13, %v185_v13  ;;  %v190_v19 = vpack.c.bf16 %v186_v14, %v186_v14  ;;  %v131_v24 = vunpack.c.l.b16 %v38_v17  ;;  %v1173_v26 = vld [vmem:[%s1626_s1] sm:$0xff]  ;;  %v55_v39 = vpack.c.bf16 %v51_v33, %v51_v33  ;;  %v1356_v54 = vld [vmem:[%s1628_s7 + $0x78] sm:$0xff] }
   0x7   :  { %171 = vmatpush.bf16.msra.mxu1 %v1175_v4  ;;  %v1174_v16 = vld [vmem:[%s1626_s1 + $0x8] sm:$0xff]  ;;  %v71_v22 = vunpack.c.l.b16 %v54_v10  ;;  %v1181_v29 = vld [vmem:[%s1626_s1 + $0x40] sm:$0xff]  ;;  %v132_v47 = vunpack.c.l.b16 %v39_v41  ;;  %292 = vmatpush.msra.mxu3 %v1356_v54  ;;  %v1363_v55 = vld [vmem:[%s1628_s7 + $0x70] sm:$0xff] }
   0x8   :  { %247 = vmatpush.bf16.msra.mxu2 %v1183_v5  ;;  %v1182_v20 = vld [vmem:[%s1626_s1 + $0x48] sm:$0xff]  ;;  %v206_v27 = vunpack.c.l.b16 %v189_v18  ;;  %v207_v28 = vunpack.c.l.b16 %v190_v19  ;;  %v134_v31 = vpack.c.b16 %v131_v24, %v130_v23  ;;  %v36_v36 = vld [vmem:[%s1627_s0 + $0x20] sm:$0xff]  ;;  %v72_v45 = vunpack.c.l.b16 %v55_v39  ;;  %v1384_v58 = vld [vmem:[%s1628_s7 + $0x58] sm:$0xff] }
   0x9   :  { %v74_v30 = vpack.c.b16 %v71_v22, %v70_v21  ;;  %v52_v34 = vld [vmem:[%s1627_s0 + $0x21] sm:$0xff]  ;;  %v40_v42 = vpack.c.bf16 %v36_v36, %v36_v36  ;;  %293 = vmatpush.msra.mxu3 %v1363_v55  ;;  %v1391_v59 = vld [vmem:[%s1628_s7 + $0x50] sm:$0xff]  ;;  %v1412_v0 = vld [vmem:[%s1628_s7 + $0x38] sm:$0xff] }
   0xa   :  { %113 = vmatpush.bf16.msra.mxu0 %v1178_v15  ;;  %v210_v32 = vpack.c.b16 %v207_v28, %v206_v27  ;;  %v187_v37 = vld [vmem:[%s1627_s0 + $0x1a] sm:$0xff]  ;;  %v188_v38 = vld [vmem:[%s1627_s0 + $0x22] sm:$0xff]  ;;  %v56_v40 = vpack.c.bf16 %v52_v34, %v52_v34  ;;  %v1419_v1 = vld [vmem:[%s1628_s7 + $0x30] sm:$0xff] }
   0xb   :  { %172 = vmatpush.bf16.msra.mxu1 %v1174_v16  ;;  %v191_v43 = vpack.c.bf16 %v187_v37, %v187_v37  ;;  %v192_v44 = vpack.c.bf16 %v188_v38, %v188_v38  ;;  %v133_v48 = vunpack.c.l.b16 %v40_v42  ;;  %v1368_v56 = vld [vmem:[%s1628_s7 + $0x68] sm:$0xff]  ;;  %v1377_v57 = vld [vmem:[%s1628_s7 + $0x60] sm:$0xff]  ;;  %v1438_v4 = vld [vmem:[%s1628_s7 + $0x18] sm:$0xff] }
   0xc   :  { %248 = vmatpush.bf16.msra.mxu2 %v1182_v20  ;;  %v73_v46 = vunpack.c.l.b16 %v56_v40  ;;  %294 = vmatpush.msra.mxu3 %v1368_v56  ;;  %v1396_v60 = vld [vmem:[%s1628_s7 + $0x48] sm:$0xff]  ;;  %v1405_v61 = vld [vmem:[%s1628_s7 + $0x40] sm:$0xff]  ;;  %v1445_v8 = vld [vmem:[%s1628_s7 + $0x10] sm:$0xff] }
   0xd   :  { %v208_v49 = vunpack.c.l.b16 %v191_v43  ;;  %v209_v50 = vunpack.c.l.b16 %v192_v44  ;;  %v135_v52 = vpack.c.b16 %v133_v48, %v132_v47  ;;  %v1426_v2 = vld [vmem:[%s1628_s7 + $0x28] sm:$0xff]  ;;  %v1433_v3 = vld [vmem:[%s1628_s7 + $0x20] sm:$0xff] }
   0xe   :  { %114 = vmatpush.bf16.msra.mxu0 %v1177_v25  ;;  %v75_v51 = vpack.c.b16 %v73_v46, %v72_v45  ;;  %295 = vmatpush.msra.mxu3 %v1377_v57  ;;  %v1452_v9 = vld [vmem:[%s1628_s7 + $0x8] sm:$0xff]  ;;  %v1459_v10 = vld [vmem:[%s1628_s7] sm:$0xff] }
   0xf   :  { %173 = vmatpush.bf16.msra.mxu1 %v1173_v26  ;;  %v211_v53 = vpack.c.b16 %v209_v50, %v208_v49  ;;  %v1468_v12 = vld [vmem:[%s1629_s8] sm:$0xff] }
  0x10   :  { %249 = vmatpush.bf16.msra.mxu2 %v1181_v29  ;;  %296 = vmatpush.msra.mxu3 %v1384_v58 }
  0x11   :  { %995 = vmatmul.msk.bf16.vlgmr.msra.gmra.mxu0 %vm100_vm0, %v74_v30 }
  0x12   :  { %1013 = vmatmul.msk.bf16.vlgmr.msra.gmra.mxu1 %vm100_vm0, %v134_v31  ;;  %372 = vmatpush.msrb.mxu0 %v1356_v54 }
  0x13   :  { %1039 = vmatmul.msk.bf16.vlgmr.msra.gmra.mxu2 %vm100_vm0, %v210_v32  ;;  %297 = vmatpush.msra.mxu3 %v1391_v59 }
  0x14   :  { %373 = vmatpush.msrb.mxu0 %v1363_v55  ;;  %423 = vmatpush.msrb.mxu1 %v1468_v12 }
  0x15   :  { %298 = vmatpush.msra.mxu3 %v1396_v60 }
  0x16   :  { %374 = vmatpush.msrb.mxu0 %v1368_v56  ;;  %803 = vmatpush.msra.mxu1 %v1356_v54 }
  0x17   :  { %299 = vmatpush.msra.mxu3 %v1405_v61 }
  0x18   :  { %375 = vmatpush.msrb.mxu0 %v1377_v57  ;;  %804 = vmatpush.msra.mxu1 %v1363_v55 }
  0x19   :  { %300 = vmatpush.msra.mxu3 %v1412_v0 }
  0x1a   :  { %376 = vmatpush.msrb.mxu0 %v1384_v58  ;;  %805 = vmatpush.msra.mxu1 %v1368_v56 }
  0x1b   :  { %301 = vmatpush.msra.mxu3 %v1419_v1 }
  0x1c   :  { %377 = vmatpush.msrb.mxu0 %v1391_v59  ;;  %806 = vmatpush.msra.mxu1 %v1377_v57 }
  0x1d   :  { %302 = vmatpush.msra.mxu3 %v1426_v2 }
  0x1e   :  { %378 = vmatpush.msrb.mxu0 %v1396_v60  ;;  %807 = vmatpush.msra.mxu1 %v1384_v58 }
  0x1f   :  { %303 = vmatpush.msra.mxu3 %v1433_v3 }
  0x20   :  { %379 = vmatpush.msrb.mxu0 %v1405_v61  ;;  %808 = vmatpush.msra.mxu1 %v1391_v59 }
  0x21   :  { %996 = vmatmul.msk.bf16.gmra.mxu0 %vm100_vm0, %v75_v51  ;;  %304 = vmatpush.msra.mxu3 %v1438_v4 }
  0x22   :  { %1014 = vmatmul.msk.bf16.gmra.mxu1 %vm100_vm0, %v135_v52  ;;  %380 = vmatpush.msrb.mxu0 %v1412_v0 }
  0x23   :  { %1040 = vmatmul.msk.bf16.gmra.mxu2 %vm100_vm0, %v211_v53  ;;  %305 = vmatpush.msra.mxu3 %v1445_v8 }
  0x24   :  { %381 = vmatpush.msrb.mxu0 %v1419_v1  ;;  %809 = vmatpush.msra.mxu1 %v1396_v60 }
  0x25   :  { %306 = vmatpush.msra.mxu3 %v1452_v9 }
  0x26   :  { %382 = vmatpush.msrb.mxu0 %v1426_v2  ;;  %810 = vmatpush.msra.mxu1 %v1405_v61 }
  0x27   :  { %307 = vmatpush.msra.mxu3 %v1459_v10 }
  0x28   :  { %383 = vmatpush.msrb.mxu0 %v1433_v3  ;;  %811 = vmatpush.msra.mxu1 %v1412_v0 }
  0x29   :  { %333 = vmatpush.msrb.mxu3 %v1468_v12 }
  0x2a   :  { %384 = vmatpush.msrb.mxu0 %v1438_v4  ;;  %812 = vmatpush.msra.mxu1 %v1419_v1 }
  0x2c   :  { %385 = vmatpush.msrb.mxu0 %v1445_v8  ;;  %813 = vmatpush.msra.mxu1 %v1426_v2 }
  0x2e   :  { %386 = vmatpush.msrb.mxu0 %v1452_v9  ;;  %814 = vmatpush.msra.mxu1 %v1433_v3 }
  0x30   :  { %387 = vmatpush.msrb.mxu0 %v1459_v10  ;;  %815 = vmatpush.msra.mxu1 %v1438_v4 }
  0x32   :  { %816 = vmatpush.msra.mxu1 %v1445_v8 }
  0x34   :  { %817 = vmatpush.msra.mxu1 %v1452_v9 }
  0x36   :  { %818 = vmatpush.msra.mxu1 %v1459_v10 }
  0x8e   :  { %v116_v62 = vpop.f32.mrf.mxu0 }
  0x8f   :  { %v175_v63 = vpop.f32.mrf.mxu1 }
  0x90   :  { %v176_v16 = vadd.f32 %v175_v63, %v116_v62 }
  0x96   :  { %v251_v5 = vpop.f32.mrf.mxu2  ;;  %v118_v6 = vpop.f32.mrf.mxu0 }
  0x97   :  { %v177_v7 = vpop.f32.mrf.mxu1  ;;  %v261_v22 = vadd.f32 %v251_v5, %v176_v16 }
  0x98   :  { %v178_v17 = vadd.f32 %v177_v7, %v118_v6  ;;  %v1200_v6 = vld [vmem:[%s1631_s4 + $0x78] sm:$0xff] }
  0x99   :  { %v1192_v7 = vld [vmem:[%s1631_s4 + $0x38] sm:$0xff]  ;;  %570 = vmatpush.bf16.msrb.mxu2 %v1200_v6 }
  0x9e   :  { %v253_v11 = vpop.f32.mrf.mxu2  ;;  %v121_v13 = vpop.f32.mrf.mxu0 }
  0x9f   :  { %v180_v14 = vpop.f32.mrf.mxu1  ;;  %v262_v19 = vadd.f32 %v253_v11, %v178_v17  ;;  %v1208_v11 = vld [vmem:[%s1631_s4 + $0xb8] sm:$0xff] }
  0xa0   :  { %v181_v18 = vadd.f32 %v180_v14, %v121_v13  ;;  %v1199_v13 = vld [vmem:[%s1631_s4 + $0x70] sm:$0xff]  ;;  %753 = vmatpush.bf16.msra.mxu0 %v1208_v11 }
  0xa1   :  { %v267_v24 = vadd.f32 %v262_v19, %v261_v22  ;;  %v1191_v14 = vld [vmem:[%s1631_s4 + $0x30] sm:$0xff]  ;;  %571 = vmatpush.bf16.msrb.mxu2 %v1199_v13 }
  0xa6   :  { %v256_v15 = vpop.f32.mrf.mxu2  ;;  %v123_v20 = vpop.f32.mrf.mxu0 }
  0xa7   :  { %v182_v21 = vpop.f32.mrf.mxu1  ;;  %v263_v23 = vadd.f32 %v256_v15, %v181_v18  ;;  %v1207_v15 = vld [vmem:[%s1631_s4 + $0xb0] sm:$0xff] }
  0xa8   :  { %v183_v25 = vadd.f32 %v182_v21, %v123_v20  ;;  %754 = vmatpush.bf16.msra.mxu0 %v1207_v15 }
  0xa9   :  { %v268_v27 = vadd.f32 %v267_v24, %v263_v23 }
  0xae   :  { %v258_v26 = vpop.f32.mrf.mxu2 }
  0xaf   :  { %v264_v28 = vadd.f32 %v258_v26, %v183_v25  ;;  %v1198_v26 = vld [vmem:[%s1631_s4 + $0x68] sm:$0xff] }
  0xb0   :  { %572 = vmatpush.bf16.msrb.mxu2 %v1198_v26 }
  0xb1   :  { %v269_v29 = vadd.f32 %v268_v27, %v264_v28  ;;  %v1197_v27 = vld [vmem:[%s1631_s4 + $0x60] sm:$0xff] }
  0xb3   :  { %v270_v30 = vrot.slane %v269_v29, 4 }
  0xb4   :  { %573 = vmatpush.bf16.msrb.mxu2 %v1197_v27 }
  0xb5   :  { %v271_v31 = vadd.f32 %v270_v30, %v269_v29  ;;  %v1206_v29 = vld [vmem:[%s1631_s4 + $0xa8] sm:$0xff]  ;;  %v1196_v30 = vld [vmem:[%s1631_s4 + $0x58] sm:$0xff] }
  0xb6   :  { %755 = vmatpush.bf16.msra.mxu0 %v1206_v29 }
  0xb7   :  { %v272_v32 = vrot.slane %v271_v31, 2 }
  0xb8   :  { %574 = vmatpush.bf16.msrb.mxu2 %v1196_v30 }
  0xb9   :  { %v273_v33 = vadd.f32 %v272_v32, %v271_v31  ;;  %v1189_v31 = vld [vmem:[%s1631_s4 + $0x20] sm:$0xff] }
  0xba   :  { %v1205_v32 = vld [vmem:[%s1631_s4 + $0xa0] sm:$0xff] }
  0xbb   :  { %v274_v34 = vrot.slane %v273_v33, 1  ;;  %756 = vmatpush.bf16.msra.mxu0 %v1205_v32 }
  0xbd   :  { %v275_v35 = vadd.f32 %v274_v34, %v273_v33  ;;  %v1195_v33 = vld [vmem:[%s1631_s4 + $0x50] sm:$0xff]  ;;  %v1188_v34 = vld [vmem:[%s1631_s4 + $0x18] sm:$0xff] }
  0xbe   :  { %575 = vmatpush.bf16.msrb.mxu2 %v1195_v33 }
  0xbf   :  { %308 = vmatmul.f32.vlgmr.msra.gmra.mxu3 %v275_v35  ;;  %v1204_v35 = vld [vmem:[%s1631_s4 + $0x98] sm:$0xff] }
  0xc0   :  { %649 = vmatpush.bf16.msra.mxu3 %v1192_v7  ;;  %757 = vmatpush.bf16.msra.mxu0 %v1204_v35 }
  0xc4   :  { %650 = vmatpush.bf16.msra.mxu3 %v1191_v14 }
 0x142   :  { %v309_v36 = vpop.f32.mrf.mxu3 }
 0x143   :  { %v312_v37 = vmul.f32 0.001953125, %v309_v36  ;;  %v1194_v36 = vld [vmem:[%s1631_s4 + $0x48] sm:$0xff] }
 0x144   :  { %576 = vmatpush.bf16.msrb.mxu2 %v1194_v36 }
 0x145   :  { %1041 = vmatmul.msk.f32.vlgmr.msrb.gmra.mxu3 %vm314_vm1, %v312_v37  ;;  %v1187_v37 = vld [vmem:[%s1631_s4 + $0x10] sm:$0xff] }
 0x1c8   :  { %v335_v38 = vpop.f32.mrf.mxu3 }
 0x1c9   :  { %v338_v39 = vperm.slane %v335_v38, 0  ;;  %v1203_v38 = vld [vmem:[%s1631_s4 + $0x90] sm:$0xff] }
 0x1ca   :  { %758 = vmatpush.bf16.msra.mxu0 %v1203_v38 }
 0x1cb   :  { %v1489_v40 = vsub.f32 %v261_v22, %v338_v39  ;;  %v1491_v41 = vsub.f32 %v262_v19, %v338_v39  ;;  %v1493_v42 = vsub.f32 %v263_v23, %v338_v39  ;;  %v1495_v43 = vsub.f32 %v264_v28, %v338_v39  ;;  %v1190_v28 = vld [vmem:[%s1631_s4 + $0x28] sm:$0xff] }
 0x1cc   :  { %651 = vmatpush.bf16.msra.mxu3 %v1190_v28  ;;  %v1224_v39 = vmov 0.0  }
 0x1cd   :  { %v343_v44 = vmul.f32 %v1489_v40, %v1489_v40  ;;  %v344_v45 = vmul.f32 %v1491_v41, %v1491_v41  ;;  %v345_v46 = vmul.f32 %v1493_v42, %v1493_v42  ;;  %v346_v48 = vmul.f32 %v1495_v43, %v1495_v43  ;;  %453 = vst [vmem:[#allocation2] sm:$0x1] %v1224_v39 }
 0x1ce   :  { %454 = vst [vmem:[#allocation2 + $0x18] sm:$0x1] %v1224_v39 }
 0x1cf   :  { %v347_v47 = vadd.f32 %v344_v45, %v343_v44  ;;  %v1193_v44 = vld [vmem:[%s1631_s4 + $0x40] sm:$0xff]  ;;  %455 = vst [vmem:[#allocation2 + $0x11] sm:$0x1] %v1224_v39  ;;  %v1186_v45 = vld [vmem:[%s1631_s4 + $0x8] sm:$0xff] }
 0x1d0   :  { %652 = vmatpush.bf16.msra.mxu3 %v1189_v31  ;;  %456 = vst [vmem:[#allocation2 + $0x29] sm:$0x1] %v1224_v39  ;;  %577 = vmatpush.bf16.msrb.mxu2 %v1193_v44 }
 0x1d1   :  { %v348_v49 = vadd.f32 %v347_v47, %v345_v46  ;;  %v1202_v46 = vld [vmem:[%s1631_s4 + $0x88] sm:$0xff]  ;;  %v1185_v47 = vld [vmem:[%s1631_s4] sm:$0xff] }
 0x1d2   :  { %759 = vmatpush.bf16.msra.mxu0 %v1202_v46 }
 0x1d3   :  { %v349_v50 = vadd.f32 %v348_v49, %v346_v48  ;;  %v1201_v48 = vld [vmem:[%s1631_s4 + $0x80] sm:$0xff] }
 0x1d4   :  { %653 = vmatpush.bf16.msra.mxu3 %v1188_v34  ;;  %1209 = vmatpush.bf16.msra.mxu2 %v1208_v11  ;;  %v265_v49 = vld [vmem:[%s1632_s2] sm:$0x1] }
 0x1d5   :  { %v350_v51 = vrot.slane %v349_v50, 4 }
 0x1d6   :  { %760 = vmatpush.bf16.msra.mxu0 %v1201_v48 }
 0x1d7   :  { %v351_v52 = vadd.f32 %v350_v51, %v349_v50 }
 0x1d8   :  { %654 = vmatpush.bf16.msra.mxu3 %v1187_v37  ;;  %1210 = vmatpush.bf16.msra.mxu2 %v1207_v15 }
 0x1d9   :  { %v352_v53 = vrot.slane %v351_v52, 2 }
 0x1db   :  { %v353_v62 = vadd.f32 %v352_v53, %v351_v52  ;;  %v1218_v53 = vld [vmem:[%s1630_s3] ss:$0 sm:$0xff] }
 0x1dc   :  { %655 = vmatpush.bf16.msra.mxu3 %v1186_v45  ;;  %1211 = vmatpush.bf16.msra.mxu2 %v1206_v29 }
 0x1dd   :  { %v354_v63 = vrot.slane %v353_v62, 1 }
 0x1df   :  { %v355_v5 = vadd.f32 %v354_v63, %v353_v62 }
 0x1e0   :  { %656 = vmatpush.bf16.msra.mxu3 %v1185_v47  ;;  %1212 = vmatpush.bf16.msra.mxu2 %v1205_v32 }
 0x1e1   :  { %388 = vmatmul.f32.vlgmr.msrb.gmra.mxu0 %v355_v5 }
 0x1e4   :  { %882 = vmatpush.msrb.mxu3 %v1356_v54  ;;  %1213 = vmatpush.bf16.msra.mxu2 %v1204_v35 }
 0x1e6   :  { %883 = vmatpush.msrb.mxu3 %v1363_v55 }
 0x1e8   :  { %884 = vmatpush.msrb.mxu3 %v1368_v56  ;;  %1214 = vmatpush.bf16.msra.mxu2 %v1203_v38 }
 0x1ea   :  { %885 = vmatpush.msrb.mxu3 %v1377_v57 }
 0x1ec   :  { %886 = vmatpush.msrb.mxu3 %v1384_v58  ;;  %1215 = vmatpush.bf16.msra.mxu2 %v1202_v46 }
 0x1ee   :  { %887 = vmatpush.msrb.mxu3 %v1391_v59 }
 0x1f0   :  { %888 = vmatpush.msrb.mxu3 %v1396_v60  ;;  %1216 = vmatpush.bf16.msra.mxu2 %v1201_v48 }
 0x1f2   :  { %889 = vmatpush.msrb.mxu3 %v1405_v61 }
 0x1f4   :  { %890 = vmatpush.msrb.mxu3 %v1412_v0 }
 0x1f6   :  { %891 = vmatpush.msrb.mxu3 %v1419_v1 }
 0x1f8   :  { %892 = vmatpush.msrb.mxu3 %v1426_v2 }
 0x1fa   :  { %893 = vmatpush.msrb.mxu3 %v1433_v3 }
 0x1fc   :  { %894 = vmatpush.msrb.mxu3 %v1438_v4 }
 0x1fe   :  { %895 = vmatpush.msrb.mxu3 %v1445_v8 }
 0x200   :  { %896 = vmatpush.msrb.mxu3 %v1452_v9 }
 0x202   :  { %897 = vmatpush.msrb.mxu3 %v1459_v10 }
 0x25e   :  { %v389_v16 = vpop.f32.mrf.mxu0 }
 0x25f   :  { %v392_v17 = vmul.f32 0.001953125, %v389_v16 }
 0x261   :  { %v393_v18 = vadd.f32 1e-05, %v392_v17 }
 0x263   :  { %1220 = vrsqrt.f32 %v393_v18  ;;  %vm400_vm3 = vweird.f32 %v393_v18 }
 0x269   :  { %v1221_v19 = vpop.eup %1220 }
 0x26a   :  { %v395_v20 = vmul.f32 %v1221_v19, %v393_v18  ;;  %vm401_vm2 = vweird.f32 %v1221_v19 }
 0x26b   :  { %vm402_vm4 = vmor %vm400_vm3, %vm401_vm2 }
 0x26c   :  { %v396_v21 = vmul.f32 %v1221_v19, %v395_v20 }
 0x26e   :  { %v397_v22 = vmul.f32 0.5, %v396_v21 }
 0x270   :  { %v398_v23 = vsub.f32 1.5, %v397_v22 }
 0x272   :  { %v399_v24 = vmul.f32 %v1221_v19, %v398_v23 }
 0x274   :  { %v403_v25 = vsel %vm402_vm4, %v1221_v19, %v399_v24 }
 0x275   :  { %1042 = vmatmul.msk.f32.vlgmr.msrb.gmra.mxu1 %vm314_vm1, %v403_v25 }
 0x276   :  { %933 = vmatpush.msrb.mxu1 %v1468_v12 }
 0x2f2   :  { %v425_v50 = vpop.f32.mrf.mxu1 }
 0x2f3   :  { %v428_v51 = vmul.f32 %v425_v50, %v265_v49 }
 0x2f5   :  { %v429_v52 = vperm.slane %v428_v51, 0 }
 0x2f7   :  { %v430_v54 = vmul.f32 %v429_v52, %v1489_v40  ;;  %v431_v62 = vmul.f32 %v429_v52, %v1491_v41  ;;  %v432_v55 = vmul.f32 %v429_v52, %v1493_v42  ;;  %v433_v63 = vmul.f32 %v429_v52, %v1495_v43 }
 0x2f9   :  { %v437_v56 = vadd.f32 %v1218_v53, %v430_v54  ;;  %v438_v57 = vadd.f32 %v1218_v53, %v431_v62  ;;  %v439_v5 = vadd.f32 %v1218_v53, %v432_v55  ;;  %v440_v6 = vadd.f32 %v1218_v53, %v433_v63 }
 0x2fb   :  { %vm441_vm5 = vcmp.gt.f32.partialorder %v437_v56, 0.0  ;;  %vm442_vm6 = vcmp.gt.f32.partialorder %v438_v57, 0.0  ;;  %vm443_vm7 = vcmp.gt.f32.partialorder %v439_v5, 0.0  ;;  %vm444_vm8 = vcmp.gt.f32.partialorder %v440_v6, 0.0 }
 0x2fc   :  { %v445_v58 = vmul.f32 0.1, %v437_v56  ;;  %v446_v40 = vmul.f32 0.1, %v438_v57  ;;  %v447_v41 = vmul.f32 0.1, %v439_v5 }
 0x2fd   :  { %v448_v42 = vmul.f32 0.1, %v440_v6 }
 0x2fe   :  { %v449_v43 = vsel %vm441_vm5, %v437_v56, %v445_v58  ;;  %v450_v7 = vsel %vm442_vm6, %v438_v57, %v446_v40  ;;  %v451_v59 = vsel %vm443_vm7, %v439_v5, %v447_v41 }
 0x2ff   :  { %v452_v11 = vsel %vm444_vm8, %v440_v6, %v448_v42  ;;  %457 = vst [vmem:[#allocation2 + $0x1] sm:$0xff] %v449_v43  ;;  %v489_v13 = vpack.c.bf16 %v449_v43, %v449_v43  ;;  %v490_v60 = vpack.c.bf16 %v450_v7, %v450_v7  ;;  %v491_v3 = vpack.c.bf16 %v451_v59, %v451_v59 }
 0x300   :  { %458 = vst [vmem:[#allocation2 + $0x9] sm:$0xff] %v450_v7  ;;  %v492_v25 = vpack.c.bf16 %v452_v11, %v452_v11 }
 0x301   :  { %459 = vst [vmem:[#allocation2 + $0x19] sm:$0xff] %v451_v59  ;;  %v514_v14 = vunpack.c.l.b16 %v489_v13  ;;  %v515_v15 = vunpack.c.l.b16 %v490_v60  ;;  %v516_v4 = vunpack.c.l.b16 %v491_v3 }
 0x302   :  { %460 = vst [vmem:[#allocation2 + $0x21] sm:$0xff] %v452_v11  ;;  %v517_v27 = vunpack.c.l.b16 %v492_v25 }
 0x303   :  { %v518_v61 = vpack.c.b16 %v515_v15, %v514_v14 }
 0x304   :  { %v519_v30 = vpack.c.b16 %v517_v27, %v516_v4 }
 0x305   :  { %578 = vmatmul.bf16.vlgmr.msrb.gmra.mxu2 %v518_v61 }
 0x306   :  { %v461_v0 = vld [vmem:[#allocation2] sm:$0xff]  ;;  %843 = vmatpush.msrb.mxu2 %v1468_v12 }
 0x307   :  { %v462_v16 = vld [vmem:[#allocation2 + $0x8] sm:$0xff]  ;;  %v465_v17 = vpack.c.bf16 %v461_v0, %v461_v0 }
 0x308   :  { %v668_v18 = vld [vmem:[#allocation2 + $0x2] sm:$0xff]  ;;  %v669_v1 = vld [vmem:[#allocation2 + $0xa] sm:$0xff]  ;;  %v466_v19 = vpack.c.bf16 %v462_v16, %v462_v16  ;;  %v463_v28 = vld [vmem:[#allocation2 + $0x18] sm:$0xff] }
 0x309   :  { %v672_v20 = vpack.c.bf16 %v668_v18, %v668_v18  ;;  %v673_v21 = vpack.c.bf16 %v669_v1, %v669_v1  ;;  %v593_v2 = vunpack.c.l.b16 %v465_v17  ;;  %v464_v29 = vld [vmem:[#allocation2 + $0x20] sm:$0xff]  ;;  %v467_v8 = vpack.c.bf16 %v463_v28, %v463_v28 }
 0x30a   :  { %v594_v22 = vunpack.c.l.b16 %v466_v19  ;;  %v468_v31 = vpack.c.bf16 %v464_v29, %v464_v29  ;;  %v670_v34 = vld [vmem:[#allocation2 + $0x1a] sm:$0xff]  ;;  %v671_v9 = vld [vmem:[#allocation2 + $0x22] sm:$0xff] }
 0x30b   :  { %v697_v23 = vunpack.c.l.b16 %v672_v20  ;;  %v698_v24 = vunpack.c.l.b16 %v673_v21  ;;  %v595_v32 = vunpack.c.l.b16 %v467_v8  ;;  %v674_v35 = vpack.c.bf16 %v670_v34, %v670_v34 }
 0x30c   :  { %v597_v12 = vpack.c.b16 %v594_v22, %v593_v2  ;;  %v596_v33 = vunpack.c.l.b16 %v468_v31  ;;  %v675_v36 = vpack.c.bf16 %v671_v9, %v671_v9 }
 0x30d   :  { %v701_v26 = vpack.c.b16 %v698_v24, %v697_v23  ;;  %v699_v38 = vunpack.c.l.b16 %v674_v35 }
 0x30e   :  { %657 = vmatmul.bf16.vlgmr.msra.gmra.mxu3 %v597_v12  ;;  %v598_v37 = vpack.c.b16 %v596_v33, %v595_v32  ;;  %v700_v10 = vunpack.c.l.b16 %v675_v36 }
 0x30f   :  { %761 = vmatmul.bf16.vlgmr.msra.gmra.mxu0 %v701_v26 }
 0x310   :  { %v702_v39 = vpack.c.b16 %v700_v10, %v699_v38 }
 0x315   :  { %583 = vmatmul.bf16.gmra.mxu2 %v519_v30 }
 0x31e   :  { %662 = vmatmul.bf16.gmra.mxu3 %v598_v37  ;;  %v776_v37 = vld [vmem:[%s1634_s5] sm:$0x1] }
 0x325   :  { %766 = vmatmul.bf16.vlgmr.msra.gmra.mxu2 %v702_v39 }
 0x388   :  { %v579_v44 = vpop.f32.mrf.mxu2 }
 0x38c   :  { %v762_v49 = vpop.f32.mrf.mxu0 }
 0x390   :  { %v581_v45 = vpop.f32.mrf.mxu2 }
 0x391   :  { %v658_v46 = vpop.f32.mrf.mxu3 }
 0x392   :  { %v659_v54 = vadd.f32 %v658_v46, %v579_v44  ;;  %v1219_v44 = vld [vmem:[%s1633_s6] ss:$0 sm:$0xff] }
 0x394   :  { %v764_v62 = vpop.f32.mrf.mxu0  ;;  %v772_v57 = vadd.f32 %v762_v49, %v659_v54 }
 0x398   :  { %v584_v47 = vpop.f32.mrf.mxu2 }
 0x399   :  { %v660_v48 = vpop.f32.mrf.mxu3 }
 0x39a   :  { %v661_v52 = vadd.f32 %v660_v48, %v581_v45 }
 0x39c   :  { %v773_v55 = vadd.f32 %v764_v62, %v661_v52 }
 0x39e   :  { %v778_v58 = vadd.f32 %v773_v55, %v772_v57 }
 0x3a0   :  { %v586_v50 = vpop.f32.mrf.mxu2 }
 0x3a1   :  { %v663_v51 = vpop.f32.mrf.mxu3 }
 0x3a2   :  { %v664_v63 = vadd.f32 %v663_v51, %v584_v47 }
 0x3a8   :  { %v767_v53 = vpop.f32.mrf.mxu2 }
 0x3a9   :  { %v665_v56 = vpop.f32.mrf.mxu3  ;;  %v774_v5 = vadd.f32 %v767_v53, %v664_v63 }
 0x3aa   :  { %v666_v6 = vadd.f32 %v665_v56, %v586_v50 }
 0x3ab   :  { %v779_v41 = vadd.f32 %v778_v58, %v774_v5 }
 0x3b0   :  { %v769_v40 = vpop.f32.mrf.mxu2 }
 0x3b1   :  { %v775_v42 = vadd.f32 %v769_v40, %v666_v6 }
 0x3b3   :  { %v780_v43 = vadd.f32 %v779_v41, %v775_v42 }
 0x3b5   :  { %v781_v7 = vrot.slane %v780_v43, 4 }
 0x3b7   :  { %v782_v59 = vadd.f32 %v781_v7, %v780_v43 }
 0x3b9   :  { %v783_v11 = vrot.slane %v782_v59, 2 }
 0x3bb   :  { %v784_v13 = vadd.f32 %v783_v11, %v782_v59 }
 0x3bd   :  { %v785_v60 = vrot.slane %v784_v13, 1 }
 0x3bf   :  { %v786_v14 = vadd.f32 %v785_v60, %v784_v13 }
 0x3c1   :  { %819 = vmatmul.f32.vlgmr.msra.gmra.mxu1 %v786_v14 }
 0x43e   :  { %v820_v15 = vpop.f32.mrf.mxu1 }
 0x43f   :  { %v823_v61 = vmul.f32 0.001953125, %v820_v15 }
 0x441   :  { %1171 = vmatmul.msk.f32.vlgmr.msrb.gmra.mxu2 %vm314_vm1, %v823_v61 }
 0x4c4   :  { %v845_v0 = vpop.f32.mrf.mxu2 }
 0x4c5   :  { %v848_v16 = vperm.slane %v845_v0, 0 }
 0x4c7   :  { %v849_v17 = vsub.f32 %v772_v57, %v848_v16  ;;  %v850_v18 = vsub.f32 %v773_v55, %v848_v16  ;;  %v851_v1 = vsub.f32 %v774_v5, %v848_v16  ;;  %v852_v19 = vsub.f32 %v775_v42, %v848_v16 }
 0x4c9   :  { %v853_v20 = vmul.f32 %v849_v17, %v849_v17  ;;  %v854_v21 = vmul.f32 %v850_v18, %v850_v18  ;;  %v855_v2 = vmul.f32 %v851_v1, %v851_v1  ;;  %v856_v23 = vmul.f32 %v852_v19, %v852_v19 }
 0x4cb   :  { %v857_v22 = vadd.f32 %v854_v21, %v853_v20 }
 0x4cd   :  { %v858_v24 = vadd.f32 %v857_v22, %v855_v2 }
 0x4cf   :  { %v859_v3 = vadd.f32 %v858_v24, %v856_v23 }
 0x4d1   :  { %v860_v25 = vrot.slane %v859_v3, 4 }
 0x4d3   :  { %v861_v12 = vadd.f32 %v860_v25, %v859_v3 }
 0x4d5   :  { %v862_v26 = vrot.slane %v861_v12, 2 }
 0x4d7   :  { %v863_v4 = vadd.f32 %v862_v26, %v861_v12 }
 0x4d9   :  { %v864_v27 = vrot.slane %v863_v4, 1 }
 0x4db   :  { %v865_v28 = vadd.f32 %v864_v27, %v863_v4 }
 0x4dd   :  { %898 = vmatmul.f32.vlgmr.msrb.gmra.mxu3 %v865_v28 }
 0x560   :  { %v899_v29 = vpop.f32.mrf.mxu3 }
 0x561   :  { %v902_v30 = vmul.f32 0.001953125, %v899_v29 }
 0x563   :  { %v903_v8 = vadd.f32 1e-05, %v902_v30 }
 0x565   :  { %1222 = vrsqrt.f32 %v903_v8  ;;  %vm910_vm10 = vweird.f32 %v903_v8 }
 0x56b   :  { %v1223_v31 = vpop.eup %1222 }
 0x56c   :  { %v905_v32 = vmul.f32 %v1223_v31, %v903_v8  ;;  %vm911_vm9 = vweird.f32 %v1223_v31 }
 0x56d   :  { %vm912_vm11 = vmor %vm910_vm10, %vm911_vm9 }
 0x56e   :  { %v906_v33 = vmul.f32 %v1223_v31, %v905_v32 }
 0x570   :  { %v907_v34 = vmul.f32 0.5, %v906_v33 }
 0x572   :  { %v908_v9 = vsub.f32 1.5, %v907_v34 }
 0x574   :  { %v909_v35 = vmul.f32 %v1223_v31, %v908_v9 }
 0x576   :  { %v913_v36 = vsel %vm912_vm11, %v1223_v31, %v909_v35 }
 0x577   :  { %1172 = vmatmul.msk.f32.vlgmr.msrb.gmra.mxu1 %vm314_vm1, %v913_v36 }
 0x5f4   :  { %v935_v38 = vpop.f32.mrf.mxu1 }
 0x5f5   :  { %v938_v10 = vmul.f32 %v935_v38, %v776_v37 }
 0x5f7   :  { %v939_v39 = vperm.slane %v938_v10, 0 }
 0x5f9   :  { %v940_v45 = vmul.f32 %v939_v39, %v849_v17  ;;  %v941_v46 = vmul.f32 %v939_v39, %v850_v18  ;;  %v942_v47 = vmul.f32 %v939_v39, %v851_v1  ;;  %v943_v48 = vmul.f32 %v939_v39, %v852_v19 }
 0x5fb   :  { %v947_v49 = vadd.f32 %v1219_v44, %v940_v45  ;;  %v948_v50 = vadd.f32 %v1219_v44, %v941_v46  ;;  %v949_v51 = vadd.f32 %v1219_v44, %v942_v47  ;;  %v950_v52 = vadd.f32 %v1219_v44, %v943_v48 }
 0x5fd   :  { %vm951_vm12 = vcmp.gt.f32.partialorder %v947_v49, 0.0  ;;  %vm952_vm13 = vcmp.gt.f32.partialorder %v948_v50, 0.0  ;;  %vm953_vm14 = vcmp.gt.f32.partialorder %v949_v51, 0.0  ;;  %vm954_vm15 = vcmp.gt.f32.partialorder %v950_v52, 0.0 }
 0x5fe   :  { %v955_v53 = vmul.f32 0.1, %v947_v49  ;;  %v956_v54 = vmul.f32 0.1, %v948_v50  ;;  %v957_v62 = vmul.f32 0.1, %v949_v51 }
 0x5ff   :  { %v958_v55 = vmul.f32 0.1, %v950_v52 }
 0x600   :  { %v959_v63 = vsel %vm951_vm12, %v947_v49, %v955_v53  ;;  %v960_v56 = vsel %vm952_vm13, %v948_v50, %v956_v54  ;;  %v961_v57 = vsel %vm953_vm14, %v949_v51, %v957_v62 }
 0x601   :  { %v962_v5 = vsel %vm954_vm15, %v950_v52, %v958_v55  ;;  %963 = vst [vmem:[%s1635_s9] sm:$0xff] %v959_v63 }
 0x602   :  { %964 = vst [vmem:[%s1635_s9 + $0x8] sm:$0xff] %v960_v56 }
 0x603   :  { %965 = vst [vmem:[%s1635_s9 + $0x10] sm:$0xff] %v961_v57 }
 0x604   :  { %966 = vst [vmem:[%s1635_s9 + $0x18] sm:$0xff] %v962_v5 }

</bundles_post_ra>
